<compile_context>
chip_gen: v7x
topology: tpu7x:2x2x1
jax: 0.10.0
libtpu: 0.0.40
codegen_flags: <defaults>
</compile_context>

<pallas_src>
import jax
import jax.numpy as jnp
from jax import lax
from jax.experimental import pallas as pl
from jax.experimental.pallas import tpu as pltpu

INPUT_SIZE = 20
HIDDEN_SIZE = 64
OUTPUT_SIZE = 1


def _round_up(n, m):
    return ((n + m - 1) // m) * m


def _auto_tile_config():
    """Pick (batch_tile, vmem_limit_bytes) from the chip's VMEM capacity.

    Per-row VMEM cost at f32 (x lane-pads 20->128, h pads 64->128):
      x tile 512 B x2 (double-buffer) + ~1 KiB of h/relu intermediates
      => ~2 KiB per batch row.
    v5e/v6e (128 MiB VMEM): TB=16384 (~32 MiB) -> raise scoped limit to 64 MiB.
    v7x     ( 64 MiB VMEM): TB= 8192 (~16 MiB) -> default 32 MiB limit is fine.
    """
    try:
        vmem_cap = pltpu.get_tpu_info().vmem_capacity_bytes
    except Exception:  # interpret mode / older runtimes: conservative default
        vmem_cap = 64 << 20
    if vmem_cap >= (96 << 20):
        return 16384, 64 << 20
    return 8192, None


def mlp_kernel(x_ref, w1_ref, b1_ref, w2_ref, b2_ref, o_ref):
    # Layer 1 on the MXU: (TB, 20) @ (20, 64) -> (TB, 64), f32 accumulate.
    h = jnp.dot(x_ref[...], w1_ref[...], preferred_element_type=jnp.float32)
    h = jnp.maximum(h + b1_ref[...], 0.0)
    # Layer 2, lane-dense: contract w2 (1, 64) with h (TB, 64) over the hidden
    # dim (transposed-rhs matmul, no explicit h.T) -> (1, TB) output row.
    y = lax.dot_general(
        w2_ref[...], h,
        dimension_numbers=(((1,), (1,)), ((), ())),
        preferred_element_type=jnp.float32)
    y = y + b2_ref[...]                      # (1, TB) + (1, 1)
    o_ref[...] = y.reshape(o_ref.shape).astype(o_ref.dtype)


def two_layer_mlp(x, w1, b1, w2, b2, *, block_batch=None, vmem_limit_bytes=None):
    """x: (B, INPUT_SIZE) f32 -> (B, OUTPUT_SIZE) f32.

    Parameter layouts:
      w1: (INPUT_SIZE, HIDDEN_SIZE)   (pre-transposed vs. PyTorch)
      b1: (1, HIDDEN_SIZE)
      w2: (OUTPUT_SIZE, HIDDEN_SIZE)  (PyTorch-native (out, in) layout)
      b2: (1, OUTPUT_SIZE)
    """
    B = x.shape[0]
    if block_batch is None:
        block_batch, auto_limit = _auto_tile_config()
        if vmem_limit_bytes is None:
            vmem_limit_bytes = auto_limit

    # Batch tile: 128-multiple for lane-dense output rows at large B; clamp to
    # round_up(B, 8) so tiny batches don't over-allocate VMEM. Always a
    # multiple of 8 (sublane) so the (tb, 20) x BlockSpec is legal.
    tb = max(8, min(_round_up(block_batch, 128), _round_up(B, 8)))
    num_tiles = pl.cdiv(B, tb)   # no padding copy: ragged last block is fine

    # Advisory cost estimate for XLA scheduling around the custom call.
    flops = 2 * B * (INPUT_SIZE * HIDDEN_SIZE + HIDDEN_SIZE * OUTPUT_SIZE)
    bytes_accessed = 4 * (B * (INPUT_SIZE + OUTPUT_SIZE)
                          + INPUT_SIZE * HIDDEN_SIZE + HIDDEN_SIZE
                          + OUTPUT_SIZE * HIDDEN_SIZE + OUTPUT_SIZE)
    cost = pl.CostEstimate(flops=flops, transcendentals=0,
                           bytes_accessed=bytes_accessed)

    out = pl.pallas_call(
        mlp_kernel,
        out_shape=jax.ShapeDtypeStruct((num_tiles, 1, tb), jnp.float32),
        grid=(num_tiles,),
        in_specs=[
            # x streams one (tb, 20) batch tile per grid step (double-buffered).
            # The last block may extend past B; those rows are unspecified and
            # their outputs are sliced off below.
            pl.BlockSpec((tb, INPUT_SIZE), lambda i: (i, 0)),
            # Weights / biases: constant index_map -> fetched once, resident.
            pl.BlockSpec((INPUT_SIZE, HIDDEN_SIZE), lambda i: (0, 0)),
            pl.BlockSpec((1, HIDDEN_SIZE), lambda i: (0, 0)),
            pl.BlockSpec((OUTPUT_SIZE, HIDDEN_SIZE), lambda i: (0, 0)),
            pl.BlockSpec((1, OUTPUT_SIZE), lambda i: (0, 0)),
        ],
        # Lane-dense (1, 1, tb) output row per batch tile (full-width vst).
        out_specs=pl.BlockSpec((1, 1, tb), lambda i: (i, 0, 0)),
        compiler_params=pltpu.CompilerParams(
            dimension_semantics=("parallel",),
            vmem_limit_bytes=vmem_limit_bytes),
        cost_estimate=cost,
    )(x, w1, b1, w2, b2)

    # (num_tiles, 1, tb) -> (num_tiles*tb, 1); drop rows past B (ragged edge).
    return out.reshape(num_tiles * tb, OUTPUT_SIZE)[:B]


def init_params(key):
    """Deterministic init mimicking nn.Linear (uniform +/- 1/sqrt(fan_in))."""
    k1, k2, k3, k4 = jax.random.split(key, 4)
    bound1 = 1.0 / jnp.sqrt(jnp.float32(INPUT_SIZE))
    bound2 = 1.0 / jnp.sqrt(jnp.float32(HIDDEN_SIZE))
    w1 = jax.random.uniform(k1, (INPUT_SIZE, HIDDEN_SIZE), jnp.float32,
                            -bound1, bound1)
    b1 = jax.random.uniform(k2, (1, HIDDEN_SIZE), jnp.float32,
                            -bound1, bound1)
    w2 = jax.random.uniform(k3, (OUTPUT_SIZE, HIDDEN_SIZE), jnp.float32,
                            -bound2, bound2)
    b2 = jax.random.uniform(k4, (1, OUTPUT_SIZE), jnp.float32,
                            -bound2, bound2)
    return w1, b1, w2, b2


if __name__ == "__main__":
    key = jax.random.PRNGKey(0)
    kx, kx2, kp = jax.random.split(key, 3)

    w1, b1, w2, b2 = init_params(kp)

    def ref_fn(xx):
        return jnp.maximum(xx @ w1 + b1, 0.0) @ w2.T + b2

    # Small batch, auto tile config (single exact block, no padding copy).
    B = 8
    x = jax.random.normal(kx, (B, INPUT_SIZE), jnp.float32)
    out = jax.block_until_ready(two_layer_mlp(x, w1, b1, w2, b2))
    assert out.shape == (B, OUTPUT_SIZE)
    assert jnp.allclose(out, ref_fn(x), atol=1e-5, rtol=1e-5)

    # Non-multiple batch with multiple tiles (exercises the ragged last
    # block: no jnp.pad, garbage edge rows are sliced off).
    B2 = 200
    x2 = jax.random.normal(kx2, (B2, INPUT_SIZE), jnp.float32)
    out2 = jax.block_until_ready(
        two_layer_mlp(x2, w1, b1, w2, b2, block_batch=128))
    assert out2.shape == (B2, OUTPUT_SIZE)
    assert jnp.allclose(out2, ref_fn(x2), atol=1e-5, rtol=1e-5)

    print("KERNEL_OK")
</pallas_src>

<mosaic_0001>
module attributes {stable_mosaic.version = 11 : i64} {
  func.func @mlp_kernel(%arg0: i32, %arg1: memref<8x20xf32, #tpu.memory_space<vmem>>, %arg2: memref<20x64xf32, #tpu.memory_space<vmem>>, %arg3: memref<1x64xf32, #tpu.memory_space<vmem>>, %arg4: memref<1x64xf32, #tpu.memory_space<vmem>>, %arg5: memref<1x1xf32, #tpu.memory_space<vmem>>, %arg6: memref<1x1x8xf32, #tpu.memory_space<vmem>>) attributes {dimension_semantics = [#tpu.dimension_semantics<parallel>], iteration_bounds = array<i64: 1>, scalar_prefetch = 0 : i64, scratch_operands = 0 : i64, tpu.core_type = #tpu.core_type<tc>, window_params = [{transform_indices = @transform_0, window_bounds = array<i64: 8, 20>}, {pipeline_mode = #tpu.pipeline_mode<synchronous>, transform_indices = @transform_1, window_bounds = array<i64: 20, 64>}, {pipeline_mode = #tpu.pipeline_mode<synchronous>, transform_indices = @transform_2, window_bounds = array<i64: 1, 64>}, {pipeline_mode = #tpu.pipeline_mode<synchronous>, transform_indices = @transform_3, window_bounds = array<i64: 1, 64>}, {pipeline_mode = #tpu.pipeline_mode<synchronous>, transform_indices = @transform_4, window_bounds = array<i64: 1, 1>}, {transform_indices = @transform_5, window_bounds = array<i64: 1, 1, 8>}]} {
    %c0 = arith.constant 0 : index
    %c0_0 = arith.constant 0 : index
    %0 = vector.load %arg1[%c0, %c0_0] : memref<8x20xf32, #tpu.memory_space<vmem>>, vector<8x20xf32>
    %c0_1 = arith.constant 0 : index
    %c0_2 = arith.constant 0 : index
    %1 = vector.load %arg2[%c0_1, %c0_2] : memref<20x64xf32, #tpu.memory_space<vmem>>, vector<20x64xf32>
    %cst = arith.constant dense<0.000000e+00> : vector<8x64xf32>
    %2 = tpu.matmul %0, %1, %cst {dimension_numbers = #tpu.dot_dimension_numbers<[1], [0], [0], [1], [0, 0, 1, 1], [], []>} : vector<8x20xf32>, vector<20x64xf32>, vector<8x64xf32> -> vector<8x64xf32>
    %c0_3 = arith.constant 0 : index
    %c0_4 = arith.constant 0 : index
    %3 = vector.load %arg3[%c0_3, %c0_4] : memref<1x64xf32, #tpu.memory_space<vmem>>, vector<1x64xf32>
    %4 = vector.broadcast %3 : vector<1x64xf32> to vector<8x64xf32>
    %5 = arith.addf %2, %4 : vector<8x64xf32>
    %cst_5 = arith.constant 0.000000e+00 : f32
    %6 = vector.broadcast %cst_5 : f32 to vector<8x64xf32>
    %7 = arith.maximumf %5, %6 : vector<8x64xf32>
    %c0_6 = arith.constant 0 : index
    %c0_7 = arith.constant 0 : index
    %8 = vector.load %arg4[%c0_6, %c0_7] : memref<1x64xf32, #tpu.memory_space<vmem>>, vector<1x64xf32>
    %cst_8 = arith.constant dense<0.000000e+00> : vector<1x8xf32>
    %9 = tpu.matmul %8, %7, %cst_8 {dimension_numbers = #tpu.dot_dimension_numbers<[1], [1], [0], [0], [0, 0, 1, 0], [], []>} : vector<1x64xf32>, vector<8x64xf32>, vector<1x8xf32> -> vector<1x8xf32>
    %c0_9 = arith.constant 0 : index
    %c0_10 = arith.constant 0 : index
    %10 = vector.load %arg5[%c0_9, %c0_10] : memref<1x1xf32, #tpu.memory_space<vmem>>, vector<1x1xf32>
    %11 = vector.broadcast %10 : vector<1x1xf32> to vector<1x8xf32>
    %12 = arith.addf %9, %11 : vector<1x8xf32>
    %13 = vector.shape_cast %12 : vector<1x8xf32> to vector<1x1x8xf32>
    %c0_11 = arith.constant 0 : index
    %c0_12 = arith.constant 0 : index
    %c0_13 = arith.constant 0 : index
    %14 = vector.load %arg6[%c0_11, %c0_12, %c0_13] : memref<1x1x8xf32, #tpu.memory_space<vmem>>, vector<1x1x8xf32>
    tpu.vector_store %arg6[%c0_11, %c0_12, %c0_13], %13 {strides = array<i32>} : memref<1x1x8xf32, #tpu.memory_space<vmem>>, vector<1x1x8xf32>,
    return
  }
  func.func @transform_0(%arg0: i32) -> (i32, i32) {
    %c0_i32 = arith.constant 0 : i32
    %c0_i32_0 = arith.constant 0 : i32
    return %arg0, %c0_i32 : i32, i32
  }
  func.func @transform_1(%arg0: i32) -> (i32, i32) {
    %c0_i32 = arith.constant 0 : i32
    %c0_i32_0 = arith.constant 0 : i32
    %c0_i32_1 = arith.constant 0 : i32
    return %c0_i32, %c0_i32_0 : i32, i32
  }
  func.func @transform_2(%arg0: i32) -> (i32, i32) {
    %c0_i32 = arith.constant 0 : i32
    %c0_i32_0 = arith.constant 0 : i32
    %c0_i32_1 = arith.constant 0 : i32
    return %c0_i32, %c0_i32_0 : i32, i32
  }
  func.func @transform_3(%arg0: i32) -> (i32, i32) {
    %c0_i32 = arith.constant 0 : i32
    %c0_i32_0 = arith.constant 0 : i32
    %c0_i32_1 = arith.constant 0 : i32
    return %c0_i32, %c0_i32_0 : i32, i32
  }
  func.func @transform_4(%arg0: i32) -> (i32, i32) {
    %c0_i32 = arith.constant 0 : i32
    %c0_i32_0 = arith.constant 0 : i32
    %c0_i32_1 = arith.constant 0 : i32
    return %c0_i32, %c0_i32_0 : i32, i32
  }
  func.func @transform_5(%arg0: i32) -> (i32, i32, i32) {
    %c0_i32 = arith.constant 0 : i32
    %c0_i32_0 = arith.constant 0 : i32
    %c0_i32_1 = arith.constant 0 : i32
    return %arg0, %c0_i32, %c0_i32_0 : i32, i32, i32
  }
}

</mosaic_0001>

<bundles_post_ra>
// kernel: tpu_custom_call.1
= control target key start
LH: loop header
LB: loop body
LE: loop exit
PB: predicated region body
PF: predicated region fallthrough
CT: control target
= control target key end

     0   :  { %s446_s0 = inlined_call_operand.hbm [shape: f32[8,20], index: 0, kind: input, shape index: {}]   ;;  %s447_s1 = inlined_call_operand.hbm [shape: f32[20,64], index: 1, kind: input, shape index: {}]   ;;  %s448_s2 = inlined_call_operand.vmem [shape: f32[1,64], index: 2, kind: input, shape index: {}]   ;;  %s449_s3 = inlined_call_operand.vmem [shape: f32[1,64], index: 3, kind: input, shape index: {}]   ;;  %s450_s4 = inlined_call_operand.<no memory space> [shape: f32[1,1], index: 4, kind: input, shape index: {}]   ;;  %s451_s5 = inlined_call_operand.hbm [shape: f32[1,1,8], index: 5, kind: output, shape index: {}]  }
   0x1   :  { %v10_v0 = vstv %s450_s4 }
   0x2   :  { %11 = vst [vmem:[#allocation2] sm:$0x1] %v10_v0 }
   0x3   :  { %12 = vsyncpa [#allocation4], 0 }
   0x4   :  { %13 = vsyncpa [#allocation7], 0 }
   0x5   :  { %14 = vsyncpa [#allocation5], 0  ;;  %s355_s20 = smov [#allocation3]   ;;  %s356_s22 = smov [#allocation6]  }
   0x6   :  { %s21_s21 = sshll.u32 %s355_s20, 4  ;;  %s30_s23 = sshll.u32 %s356_s22, 4  ;;  %s22_s21 = int_to_ptr.vmem [resolvable:$true] %s21_s21  ;;  %s397_s23 = int_to_ptr.vmem [resolvable:$true] %s30_s23 }
   0x7   :  { %s283_s26 = scalar_lea.hbm %s446_s0, 128 }
   0x8   :  { %p284_p0 = scmp.ne.s32.totalorder %s446_s0, %s283_s26  ;;  %p287_p1 = scmp.lt.u32.totalorder %s283_s26, %s446_s0 }
   0xa   :  { %p289_p2 = pnand %p287_p1, %p284_p0 }
   0xc   :  { %292 = shalt.err (!%p289_p2)
}
   0xd   :  { %s293_s30 = scalar_lea.vmem %s22_s21, 128  ;;  %p298_p4 = scmp.lt.s32.totalorder %s22_s21, %s22_s21 }
   0xe   :  { %p294_p3 = scmp.ne.s32.totalorder %s22_s21, %s293_s30  ;;  %p299_p5 = scmp.lt.s32.totalorder %s293_s30, %s293_s30 }
  0x10   :  { %p300_p6 = por %p299_p5, %p298_p4 }
  0x12   :  { %p301_p7 = pnand %p300_p6, %p294_p3 }
  0x14   :  { %304 = shalt.err (!%p301_p7)
}
  0x15   :  { %24 = dma.hbm_to_vmem [thread:$0]  %s446_s0, 128, %s22_s21, [#allocation4]  }
  0x16   :  { %s305_s10 = scalar_lea.hbm %s447_s1, 384 }
  0x17   :  { %p306_p8 = scmp.ne.s32.totalorder %s447_s1, %s305_s10  ;;  %p309_p9 = scmp.lt.u32.totalorder %s305_s10, %s447_s1 }
  0x19   :  { %p311_p10 = pnand %p309_p9, %p306_p8 }
  0x1b   :  { %314 = shalt.err (!%p311_p10)
}
  0x1c   :  { %s315_s15 = scalar_lea.vmem %s397_s23, 384  ;;  %p320_p12 = scmp.lt.s32.totalorder %s397_s23, %s397_s23 }
  0x1d   :  { %p316_p11 = scmp.ne.s32.totalorder %s397_s23, %s315_s15  ;;  %p321_p13 = scmp.lt.s32.totalorder %s315_s15, %s315_s15 }
  0x1f   :  { %p322_p0 = por %p321_p13, %p320_p12 }
  0x21   :  { %p323_p1 = pnand %p322_p0, %p316_p11 }
  0x23   :  { %326 = shalt.err (!%p323_p1)
}
  0x24   :  { %s357_s0 = smov 128   ;;  %s358_s16 = smov 8  }
  0x25   :  { %36 = dma.hbm_to_vmem [thread:$0]  %s447_s1, 384, %s397_s23, [#allocation7], %s357_s0, %s357_s0, %s358_s16  }
  0x26   :  { %349 = dma.done.wait [#allocation4], 128  }
  0x27   :  { %350 = vsyncadd [#allocation4], 4294967168 }
  0x28   :  { %351 = dma.done.wait [#allocation7], 384  }
  0x29   :  { %352 = vsyncadd [#allocation7], 4294966912  ;;  %v359_v1 = vmov 0.0|0.0   ;;  %vm360_vm0 = vmmov 0   ;;  %v361_v2 = vmov 0.0   ;;  %v50_v3 = vld [vmem:[#allocation6] sm:$0xff]  ;;  %v146_v16 = vlaneseq }
  0x2a   :  { %270 = vmatprep.subr.bf16.mxu0 %v359_v1  ;;  %262 = vmatprep.mubr.msk.f32.mxu0 %vm360_vm0, %v361_v2  ;;  %v51_v4 = vld [vmem:[#allocation6 + $0x8] sm:$0xff]  ;;  %v52_v6 = vld [vmem:[#allocation6 + $0x10] sm:$0xf]  ;;  %vm64_vm1 = vcmask 1043456   ;;  %v49_v7 = vld [vmem:[#allocation3] sm:$0xff]  ;;  %vm60_vm2 = vcmask 162816  }
  0x2b   :  { %265 = vmatprep.subr.mxu1 %v361_v2  ;;  %267 = vmatprep.mubr.msk.f32.mxu1 %vm360_vm0, %v361_v2  ;;  %v271_v5 = vpack.c.bf16 %v51_v4, %v50_v3  ;;  %v140_v8 = vld [vmem:[#allocation2] sm:$0x1]  ;;  %v362_v9 = vmov 0   ;;  %vm150_vm3 = vcmask 523264   ;;  %v147_v17 = vshrl.u32 %v146_v16, 7  ;;  %s363_s22 = smov [#allocation8]  }
  0x2c   :  { %282 = vset.pattern.permute.xlu0 %v362_v9  ;;  %v245_v10 = vld [vmem:[%s448_s2] ss:$0 sm:$0xff]  ;;  %s235_s23 = sshll.u32 %s363_s22, 4  ;;  %vm227_vm4 = vcmask 57344   ;;  %s236_s23 = int_to_ptr.vmem [resolvable:$true] %s235_s23 }
  0x2d   :  { %272 = vmatpush3.bf16.msra.mxu0 %v271_v5  ;;  %143 = vperm.xlu0 %282, %v140_v8   ;;  %v139_v15 = vld [vmem:[%s449_s3] sm:$0x1]  ;;  %v148_v18 = vsub.s32 0, %v147_v17  ;;  %s327_s2 = scalar_lea.vmem %s236_s23, 16  ;;  %s331_s24 = scalar_lea.vmem %s236_s23, 32 }
  0x2e   :  { %260 = vmatprep.subr.mxu0 %v361_v2  ;;  %p328_p2 = scmp.ne.s32.totalorder %s236_s23, %s327_s2  ;;  %p332_p3 = scmp.lt.s32.totalorder %s236_s23, %s236_s23 }
  0x2f   :  { %p333_p4 = scmp.lt.s32.totalorder %s331_s24, %s327_s2 }
  0x31   :  { %261 = vmatpush3.msk.msra.mxu0 %vm64_vm1, %v52_v6  ;;  %p334_p5 = por %p333_p4, %p332_p3 }
  0x32   :  { %263 = vmatmul.mubr.msk.f32.vlgmr.msra.gmra.mrb[0].mxu0 %vm60_vm2, %v49_v7 }
  0x33   :  { %p335_p6 = pnand %p334_p5, %p328_p2 }
  0xac   :  { %v144_v19 = vpop.permute.xlu0 %143 }
  0xad   :  { %v149_v20 = vrot.slane %v144_v19, %v148_v18 }
 0x105   :  { %v134_v11 = vpop.f32.mrb[0].mxu0 }
 0x106   :  { %v135_v12 = vadd.f32 %v245_v10, %v134_v11  ;;  %v264_v13 = vpop.f32.mrb[1].mxu0 }
 0x108   :  { %v138_v14 = vmax.f32 %v135_v12, 0.0 }
 0x10a   :  { %266 = vmatpush3.xpose.msk.msra.mxu1 %vm150_vm3, %v138_v14 }
 0x10d   :  { %268 = vmatmul.mubr.msk.f32.vlgmr.msra.gmra.mrb[0].mxu1 %vm150_vm3, %v139_v15 }
 0x1e0   :  { %v223_v21 = vpop.f32.mrb[0].mxu1 }
 0x1e1   :  { %v224_v22 = vadd.f32 %v223_v21, %v149_v20  ;;  %v269_v23 = vpop.f32.mrb[1].mxu1 }
 0x1e3   :  { %228 = vst.msk [vmem:[#allocation8] sm:$0x1] %vm227_vm4, %v224_v22 }
 0x1e4   :  { %338 = shalt.err (!%p335_p6)
}
 0x1e5   :  { %s339_s26 = scalar_lea.hbm %s451_s5, 16 }
 0x1e6   :  { %p340_p7 = scmp.ne.s32.totalorder %s451_s5, %s339_s26  ;;  %p343_p8 = scmp.lt.u32.totalorder %s339_s26, %s451_s5 }
 0x1e8   :  { %p345_p9 = pnand %p343_p8, %p340_p7 }
 0x1ea   :  { %348 = shalt.err (!%p345_p9)
}
 0x1eb   :  { %238 = dma.vmem_to_hbm [thread:$0]  %s236_s23, 16, %s451_s5, [#allocation5]  }
 0x1ec   :  { %353 = dma.done.wait [#allocation5], 16  }
 0x1ed   :  { %354 = vsyncadd [#allocation5], 4294967280 }
 0x1ee   :  { %242 = vsyncpa [#allocation4], 1 }
 0x1ef   :  { %243 = vsyncpa [#allocation7], 1 }
 0x1f0   :  { %244 = vsyncpa [#allocation5], 1 }

</bundles_post_ra>
